<compile_context>
chip_gen: v7x
topology: tpu7x:2x2x1
jax: 0.10.0
libtpu: 0.0.40
codegen_flags: <defaults>
</compile_context>

<pallas_src>
import math

import jax
import jax.numpy as jnp
from jax.experimental import pallas as pl
from jax.experimental.pallas import tpu as pltpu


def _make_kernel(compute_dtype, seq_len):
    def kernel(x_ref, w_ref, o_ref):
        # x_ref: (L, C)   w_ref: (3, C, TD)   o_ref: (L, TD)
        xc = x_ref[...].astype(compute_dtype)
        # Block covers the FULL L axis, so an in-tile circular roll is exactly
        # the Conv1d 'circular' padding.
        xp = pltpu.roll(xc, shift=1, axis=0)            # x[(t-1) % L]
        xn = pltpu.roll(xc, shift=seq_len - 1, axis=0)  # x[(t+1) % L]
        acc = jnp.dot(xp, w_ref[0], preferred_element_type=jnp.float32)
        acc = acc + jnp.dot(xc, w_ref[1], preferred_element_type=jnp.float32)
        acc = acc + jnp.dot(xn, w_ref[2], preferred_element_type=jnp.float32)
        o_ref[...] = acc.astype(o_ref.dtype)

    return kernel


def _pick_td(Dp, B, L, C, out_itemsize, comp_itemsize, td_max):
    """Largest multiple-of-128 divisor of Dp that fits a conservative VMEM
    budget; shrunk further if it would leave fewer than 2 grid blocks."""
    hi = min(td_max, Dp)
    cands = [td for td in range(hi, 127, -128) if Dp % td == 0]
    if not cands:
        cands = [Dp]
    budget = 12 * 1024 * 1024  # stays under every generation's scoped default
    td = cands[-1]
    for cand in cands:
        vmem = (2 * L * cand * out_itemsize      # double-buffered out tile
                + 2 * L * cand * 4               # f32 accumulator temporaries
                + 2 * 3 * C * cand * comp_itemsize
                + 2 * L * C * 4)
        if vmem <= budget:
            td = cand
            break
    # v7x has 2 TensorCores: make sure the grid has at least 2 blocks.
    if B * (Dp // td) < 2:
        smaller = [t for t in cands if Dp // t >= 2]
        if smaller:
            td = smaller[0]
    return td


def token_embedding(x, weight, *, compute_dtype=jnp.bfloat16, out_dtype=None,
                    td_max=1024):
    """Circular Conv1d token embedding.

    Args:
      x:      (B, L, C_in) activations (module input layout).
      weight: (d_model, c_in, 3) PyTorch Conv1d weight layout.
      compute_dtype: MXU operand dtype (bf16 default; f32 accumulation always).
      out_dtype: output dtype (defaults to x.dtype).
    Returns:
      (B, L, d_model)
    """
    B, L, C = x.shape
    D = weight.shape[0]
    out_dtype = x.dtype if out_dtype is None else out_dtype

    # Lane-dense output: pad d_model to a multiple of 128 (no-op for typical
    # production d_model); sliced off at the end.
    Dp = ((D + 127) // 128) * 128
    w = jnp.transpose(weight, (2, 1, 0)).astype(compute_dtype)  # (3, C, D)
    if Dp != D:
        w = jnp.pad(w, ((0, 0), (0, 0), (0, Dp - D)))

    out_itemsize = jnp.dtype(out_dtype).itemsize
    comp_itemsize = jnp.dtype(compute_dtype).itemsize
    TD = _pick_td(Dp, B, L, C, out_itemsize, comp_itemsize, td_max)
    n_d = Dp // TD
    grid = (B, n_d)

    cost = pl.CostEstimate(
        flops=2 * B * L * 3 * C * Dp,
        transcendentals=0,
        bytes_accessed=(B * L * C * jnp.dtype(x.dtype).itemsize
                        + 3 * C * Dp * comp_itemsize
                        + B * L * Dp * out_itemsize),
    )

    out = pl.pallas_call(
        _make_kernel(compute_dtype, L),
        out_shape=jax.ShapeDtypeStruct((B, L, Dp), out_dtype),
        grid_spec=pl.GridSpec(
            grid=grid,
            in_specs=[
                # Full (L, C) slab per batch element; x is read exactly once.
                pl.BlockSpec((pl.Squeezed(), L, C), lambda b, j: (b, 0, 0)),
                # Weight tiled along the output-feature axis only (tiny).
                pl.BlockSpec((3, C, TD), lambda b, j: (0, 0, j)),
            ],
            out_specs=pl.BlockSpec((pl.Squeezed(), L, TD),
                                   lambda b, j: (b, 0, j)),
        ),
        compiler_params=pltpu.CompilerParams(
            dimension_semantics=("parallel", "parallel")),
        cost_estimate=cost,
    )(x, w)

    return out[..., :D] if Dp != D else out


def _reference(x, weight):
    # Pure-JAX f32 reference of circular conv1d (k=3, padding=1, no bias).
    x_prev = jnp.roll(x, shift=1, axis=1)
    x_next = jnp.roll(x, shift=-1, axis=1)
    w = jnp.transpose(weight, (2, 1, 0))  # (3, C, D)
    return (jnp.einsum("blc,cd->bld", x_prev, w[0])
            + jnp.einsum("blc,cd->bld", x, w[1])
            + jnp.einsum("blc,cd->bld", x_next, w[2]))


if __name__ == "__main__":
    key = jax.random.PRNGKey(0)
    B, L, c_in, d_model = 2, 16, 4, 32

    kx, kw = jax.random.split(key)
    x = jax.random.normal(kx, (B, L, c_in), dtype=jnp.float32)

    # Deterministic Kaiming-normal init (fan_in, leaky_relu, slope=0.01),
    # matching nn.init.kaiming_normal_ on the Conv1d weight.
    fan_in = c_in * 3
    gain = math.sqrt(2.0 / (1.0 + 0.01 ** 2))
    std = gain / math.sqrt(fan_in)
    weight = std * jax.random.normal(kw, (d_model, c_in, 3), dtype=jnp.float32)

    ref = _reference(x, weight)

    # Exact-parity check with f32 compute.
    out_f32 = token_embedding(x, weight, compute_dtype=jnp.float32)
    out_f32 = jax.block_until_ready(out_f32)
    assert out_f32.shape == (B, L, d_model)
    assert jnp.allclose(out_f32, ref, atol=1e-5, rtol=1e-5)

    # Production bf16-compute path (f32 accumulation); relaxed tolerance.
    out_bf16 = token_embedding(x, weight)  # compute_dtype defaults to bf16
    out_bf16 = jax.block_until_ready(out_bf16)
    assert out_bf16.shape == (B, L, d_model)
    assert jnp.allclose(out_bf16.astype(jnp.float32), ref, atol=5e-2, rtol=5e-2)

    print("KERNEL_OK")
</pallas_src>

<mosaic_0001>
module attributes {stable_mosaic.version = 11 : i64} {
  func.func @kernel(%arg0: i32, %arg1: i32, %arg2: memref<1x16x4xf32, #tpu.memory_space<vmem>>, %arg3: memref<3x4x128xf32, #tpu.memory_space<vmem>>, %arg4: memref<1x16x128xf32, #tpu.memory_space<vmem>>) attributes {dimension_semantics = [#tpu.dimension_semantics<parallel>, #tpu.dimension_semantics<parallel>], iteration_bounds = array<i64: 2, 1>, scalar_prefetch = 0 : i64, scratch_operands = 0 : i64, tpu.core_type = #tpu.core_type<tc>, window_params = [{transform_indices = @transform_0, window_bounds = array<i64: 1, 16, 4>}, {transform_indices = @transform_1, window_bounds = array<i64: 3, 4, 128>}, {transform_indices = @transform_2, window_bounds = array<i64: 1, 16, 128>}]} {
    %c0 = arith.constant 0 : index
    %c0_0 = arith.constant 0 : index
    %c0_1 = arith.constant 0 : index
    %0 = vector.load %arg2[%c0, %c0_0, %c0_1] : memref<1x16x4xf32, #tpu.memory_space<vmem>>, vector<1x16x4xf32>
    %1 = vector.shape_cast %0 : vector<1x16x4xf32> to vector<16x4xf32>
    %c1_i32 = arith.constant 1 : i32
    %2 = tpu.dynamic_rotate %1 by %c1_i32 dim 0 : vector<16x4xf32>, i32 -> vector<16x4xf32>
    %c15_i32 = arith.constant 15 : i32
    %3 = tpu.dynamic_rotate %1 by %c15_i32 dim 0 : vector<16x4xf32>, i32 -> vector<16x4xf32>
    %c0_2 = arith.constant 0 : index
    %c0_3 = arith.constant 0 : index
    %c0_4 = arith.constant 0 : index
    %4 = vector.load %arg3[%c0_2, %c0_3, %c0_4] : memref<3x4x128xf32, #tpu.memory_space<vmem>>, vector<1x4x128xf32>
    %5 = vector.shape_cast %4 : vector<1x4x128xf32> to vector<4x128xf32>
    %cst = arith.constant dense<0.000000e+00> : vector<16x128xf32>
    %6 = tpu.matmul %2, %5, %cst {dimension_numbers = #tpu.dot_dimension_numbers<[1], [0], [0], [1], [0, 0, 1, 1], [], []>} : vector<16x4xf32>, vector<4x128xf32>, vector<16x128xf32> -> vector<16x128xf32>
    %c1 = arith.constant 1 : index
    %c0_5 = arith.constant 0 : index
    %c0_6 = arith.constant 0 : index
    %7 = vector.load %arg3[%c1, %c0_5, %c0_6] : memref<3x4x128xf32, #tpu.memory_space<vmem>>, vector<1x4x128xf32>
    %8 = vector.shape_cast %7 : vector<1x4x128xf32> to vector<4x128xf32>
    %cst_7 = arith.constant dense<0.000000e+00> : vector<16x128xf32>
    %9 = tpu.matmul %1, %8, %cst_7 {dimension_numbers = #tpu.dot_dimension_numbers<[1], [0], [0], [1], [0, 0, 1, 1], [], []>} : vector<16x4xf32>, vector<4x128xf32>, vector<16x128xf32> -> vector<16x128xf32>
    %10 = arith.addf %6, %9 : vector<16x128xf32>
    %c2 = arith.constant 2 : index
    %c0_8 = arith.constant 0 : index
    %c0_9 = arith.constant 0 : index
    %11 = vector.load %arg3[%c2, %c0_8, %c0_9] : memref<3x4x128xf32, #tpu.memory_space<vmem>>, vector<1x4x128xf32>
    %12 = vector.shape_cast %11 : vector<1x4x128xf32> to vector<4x128xf32>
    %cst_10 = arith.constant dense<0.000000e+00> : vector<16x128xf32>
    %13 = tpu.matmul %3, %12, %cst_10 {dimension_numbers = #tpu.dot_dimension_numbers<[1], [0], [0], [1], [0, 0, 1, 1], [], []>} : vector<16x4xf32>, vector<4x128xf32>, vector<16x128xf32> -> vector<16x128xf32>
    %14 = arith.addf %10, %13 : vector<16x128xf32>
    %c0_11 = arith.constant 0 : index
    %c0_12 = arith.constant 0 : index
    %c0_13 = arith.constant 0 : index
    %15 = vector.load %arg4[%c0_11, %c0_12, %c0_13] : memref<1x16x128xf32, #tpu.memory_space<vmem>>, vector<1x16x128xf32>
    %16 = vector.shape_cast %15 : vector<1x16x128xf32> to vector<16x128xf32>
    %17 = vector.shape_cast %14 : vector<16x128xf32> to vector<1x16x128xf32>
    tpu.vector_store %arg4[%c0_11, %c0_12, %c0_13], %17 {strides = array<i32>} : memref<1x16x128xf32, #tpu.memory_space<vmem>>, vector<1x16x128xf32>,
    return
  }
  func.func @transform_0(%arg0: i32, %arg1: i32) -> (i32, i32, i32) {
    %c0_i32 = arith.constant 0 : i32
    %c0_i32_0 = arith.constant 0 : i32
    %c0_i32_1 = arith.constant 0 : i32
    return %arg0, %c0_i32, %c0_i32_0 : i32, i32, i32
  }
  func.func @transform_1(%arg0: i32, %arg1: i32) -> (i32, i32, i32) {
    %c0_i32 = arith.constant 0 : i32
    %c0_i32_0 = arith.constant 0 : i32
    %c0_i32_1 = arith.constant 0 : i32
    return %c0_i32, %c0_i32_0, %arg1 : i32, i32, i32
  }
  func.func @transform_2(%arg0: i32, %arg1: i32) -> (i32, i32, i32) {
    %c0_i32 = arith.constant 0 : i32
    %c0_i32_0 = arith.constant 0 : i32
    return %arg0, %c0_i32, %arg1 : i32, i32, i32
  }
}

</mosaic_0001>

<bundles_post_ra>
// kernel: tpu_custom_call.1
= control target key start
LH: loop header
LB: loop body
LE: loop exit
PB: predicated region body
PF: predicated region fallthrough
CT: control target
= control target key end

     0   :  { %7 = vsyncpa [#allocation3], 0  ;;  %s898_s0 = inlined_call_operand.vmem [shape: f32[2,16,4], index: 0, kind: input, shape index: {}]   ;;  %s899_s1 = inlined_call_operand.vmem [shape: f32[3,4,128], index: 1, kind: input, shape index: {}]   ;;  %s900_s2 = inlined_call_operand.hbm [shape: f32[2,16,128], index: 2, kind: output, shape index: {}]  }
   0x1   :  { %9 = vsyncpa [#allocation3 + $0x1], 0  ;;  %s762_s9 = smov 0   ;;  %s764_s10 = smov 0  }
   0x2   :  { %s766_s11 = smov 0   ;;  %s768_s12 = smov 0  }
   0x3   :  { %s770_s13 = smov 0   ;;  %s772_s14 = smov 0  }
   0x4 LB: > { %s552_s15 = sadd.s32 4294967295, %s742_s14   ;;  %s553_s16 = sadd.s32 4294967294, %s742_s14   ;;  %s742_s14 = sphi %s772_s14, %s15_s14   ;;  %s738_s13 = sphi %s770_s13, %s907_s13   ;;  %s734_s12 = sphi %s768_s12, %s906_s12   ;;  %s730_s11 = sphi %s766_s11, %s905_s11   ;;  %s726_s10 = sphi %s764_s10, %s904_s10   ;;  %s722_s9 = sphi %s762_s9, %s903_s9  }
   0x5   : > { %s27_s17 = sadd.s32 1, %s738_s13  ;;  %s88_s18 = sadd.s32 1, %s730_s11 }
   0x6   : > { %p29_p0 = scmp.ge.s32.totalorder %s27_s17, 2  ;;  %p98_p1 = scmp.ne.s32.totalorder %s730_s11, %s726_s10 }
   0x7   : > { %p99_p2 = scmp.eq.s32.totalorder %s552_s15, 1  ;;  %p104_p3 = scmp.ne.s32.totalorder %s726_s10, %s722_s9 }
   0x8   : > { %s909_s17 = smov (%p29_p0, %s27_s17), 0  ;;  %p105_p5 = scmp.eq.s32.totalorder %s553_s16, 1 }
   0x9   : > { %p802_p4 = por %p99_p2, %p98_p1  ;;  %s83_s20 = ssub.s32 %s738_s13, %s909_s17 }
   0xa   : > { %p557_p6 = scmp.ge.s32.totalorder %s742_s14, 1  ;;  %p86_p7 = scmp.eq.s32.totalorder %s83_s20, 0 }
   0xb   : > { %p809_p8 = por %p105_p5, %p104_p3  ;;  %p138_p9 = scmp.lt.s32.totalorder %s742_s14, 3 }
   0xc   : > { %s815_s22 = scalar_select %p86_p7, %s730_s11, %s88_s18  }
   0xd   : > { %p139_p10 = pnand %p557_p6, %p138_p9 }
   0xe   : > { %v187_v0 = vld [vmem:[%s899_s1] sm:$0xf] (!%p139_p10)  ;;  %vm197_vm0 = vcmask (!%p139_p10), 1043456   ;;  %p164_p11 = scmp.lt.s32.totalorder (!%p139_p10), %s734_s12, 1  ;;  %v177_v1 = vlaneseq (!%p139_p10)  ;;  %v568_v2 = vld [vmem:[%s899_s1 + $0x8] sm:$0xf] (!%p139_p10) }
   0xf   : > { %142 = sbr.rel (%p139_p10) target bundleno = 269 (0x10d), region = 28  ;;  %593 = vmatprep.subr.msk.mxu0 (!%p139_p10), %vm197_vm0, %v187_v0  ;;  %v561_v3 = vld [vmem:[%s899_s1 + $0x4] sm:$0xf] (!%p139_p10)  ;;  %vm190_vm2 = vcmask (!%p139_p10), 31744   ;;  %s161_s6 = sand.u32 (!%p139_p10), 1, %s726_s10  }
  0x10   : > { %594 = vmatpush3.msk.msra.mxu0 (!%p139_p10), %vm197_vm0, %v187_v0  ;;  %v178_v4 = vshrl.u32 (!%p139_p10), %v177_v1, 7  ;;  %588 = vmatprep.subr.msk.mxu1 (!%p139_p10), %vm197_vm0, %v561_v3  ;;  %s558_s7 = sshll.u32 (!%p139_p10), %s161_s6, 4  ;;  %s578_s16 = sshll.u32 (!%p139_p10), %s734_s12, 8 }
  0x11   : > { %598 = vmatprep.subr.msk.mxu0 (!%p139_p10), %vm197_vm0, %v568_v2  ;;  %589 = vmatpush3.msk.msra.mxu1 (!%p139_p10), %vm197_vm0, %v561_v3  ;;  %s163_s8 = scalar_lea.vmem (!%p139_p10), [#allocation2], %s558_s7  ;;  %s850_s23 = scalar_lea.hbm (!%p139_p10), %s900_s2, %s578_s16 }
  0x12   : > { %vm179_vm1 = vcmp.lt.s32.totalorder (!%p139_p10), %v178_v4, 1  ;;  %vm184_vm3 = vcmp.lt.s32.totalorder (!%p139_p10), %v178_v4, 7  ;;  %s465_s15 = sshll.u32 (!%p139_p10), %s163_s8, 4  ;;  %s852_s24 = scalar_lea.sflag (!%p139_p10), [#allocation3], %s161_s6  ;;  %s845_s15 = int_to_ptr.vmem [resolvable:$true] %s465_s15 }
  0x13   : > { %s664_s25 = scalar_lea.vmem (!%p139_p10), %s845_s15, 256 }
  0x14   : > { %p665_p12 = scmp.ne.s32.totalorder (!%p139_p10), %s845_s15, %s664_s25 }
  0x16   : > { %s165_s29 = scalar_select %p164_p11, %s734_s12, 1 }
  0x17   : > { %p666_p13 = pnand %p665_p12, %p802_p4  ;;  %s744_s12 = smov [#allocation2]  }
  0x18   : > { %s577_s30 = sshll.u32 %s165_s29, 4  ;;  %s668_s26 = sshll.u32 %s744_s12, 4  ;;  %s669_s26 = int_to_ptr.vmem [resolvable:$false] %s668_s26 }
  0x19   : > { %s168_s5 = scalar_lea.vmem %s898_s0, %s577_s30  ;;  %p667_p0 = pneg %p666_p13 }
  0x1a   : > { %v173_v5 = vld [vmem:[%s168_s5] sm:$0xff]  ;;  %v174_v6 = vld [vmem:[%s168_s5 + $0x8] sm:$0xff]  ;;  %s670_s27 = scalar_lea.vmem %s669_s26, 512  ;;  %p671_p1 = scmp.lt.s32.totalorder %s845_s15, %s669_s26 }
  0x1b   : > { %v175_v7 = vrot.slane %v173_v5, 7  ;;  %v176_v8 = vrot.slane %v174_v6, 7  ;;  %590 = vmatprep.mubr.msk.f32.mxu1 %vm190_vm2, %v173_v5  ;;  %v182_v9 = vrot.slane %v173_v5, 1  ;;  %v183_v10 = vrot.slane %v174_v6, 1  ;;  %p672_p2 = scmp.lt.s32.totalorder %s670_s27, %s664_s25 }
  0x1c   : > { %591 = vmatmul.mubr.msk.f32.vlgmr.msra.gmra.mrb[0].mxu1 %vm190_vm2, %v174_v6 }
  0x1d   : > { %v181_v11 = vsel %vm179_vm1, %v176_v8, %v175_v7  ;;  %v180_v12 = vsel %vm179_vm1, %v175_v7, %v176_v8  ;;  %v185_v13 = vsel %vm184_vm3, %v182_v9, %v183_v10  ;;  %v186_v14 = vsel %vm184_vm3, %v183_v10, %v182_v9  ;;  %p673_p3 = por %p672_p2, %p671_p1 }
  0x1e   : > { %595 = vmatprep.mubr.msk.f32.mxu0 %vm190_vm2, %v181_v11 }
  0x1f   : > { %596 = vmatmul.mubr.msk.f32.vlgmr.msra.gmra.mrb[0].mxu0 %vm190_vm2, %v180_v12  ;;  %p674_p5 = pnand %p673_p3, %p667_p0 }
  0x20   : > { %599 = vmatpush3.msk.msra.mxu0 %vm197_vm0, %v568_v2  ;;  %600 = vmatprep.mubr.msk.f32.mxu0 %vm190_vm2, %v185_v13 }
  0x27   : > { %601 = vmatmul.mubr.msk.f32.vlgmr.msra.gmra.mrb[0].mxu0 %vm190_vm2, %v186_v14 }
  0xef   : > { %v592_v15 = vpop.f32.mrb[0].mxu1 }
  0xf0   : > { %v267_v16 = vpop.f32.mrb[1].mxu1 }
  0xfa   : > { %v602_v17 = vpop.f32.mrb[0].mxu0 }
  0xfb   : > { %v603_v18 = vadd.f32 %v602_v17, %v592_v15  ;;  %v437_v19 = vpop.f32.mrb[1].mxu0 }
  0xfc   : > { %v604_v20 = vadd.f32 %v437_v19, %v267_v16 }
  0xfd   : > { %449 = vst [vmem:[%s163_s8 + $0x8] sm:$0xff] %v603_v18 }
  0xfe   : > { %448 = vst [vmem:[%s163_s8] sm:$0xff] %v604_v20 }
  0xff   : > { %677 = shalt.err (!%p674_p5)
}
 0x100   : > { %s678_s28 = scalar_lea.hbm %s850_s23, 256  ;;  %s682_s3 = scalar_lea.hbm %s900_s2, 512 }
 0x101   : > { %p679_p6 = scmp.ne.s32.totalorder %s850_s23, %s678_s28  ;;  %p683_p10 = scmp.lt.u32.totalorder %s850_s23, %s900_s2 }
 0x102   : > { %p684_p11 = scmp.lt.u32.totalorder %s682_s3, %s678_s28  ;;  %p686_p13 = scmp.lt.u32.totalorder %s678_s28, %s850_s23 }
 0x103   : > { %p680_p7 = pnand %p679_p6, %p802_p4 }
 0x104   : > { %p685_p12 = por %p684_p11, %p683_p10 }
 0x105   : > { %p681_p9 = pneg %p680_p7 }
 0x106   : > { %p687_p0 = por %p686_p13, %p685_p12 }
 0x108   : > { %p688_p1 = pnand %p687_p0, %p681_p9 }
 0x10a   : > { %691 = shalt.err (!%p688_p1)
}
 0x10b   : > { %s745_s6 = smov 128   ;;  %s746_s7 = smov 8  }
 0x10c   : > { %607 = dma.vmem_to_hbm [thread:$0]  (%p802_p4), %s845_s15, 256, %s850_s23, %s852_s24, %s745_s6, %s745_s6, %s746_s7  }
 0x10d PF: > { %p613_p2 = scmp.ge.s32.totalorder %s742_s14, 2  ;;  %s480_s8 = sand.u32 1, %s722_s9  }
 0x10e   : > { %s481_s16 = scalar_lea.sflag [#allocation3], %s480_s8 }
 0x10f   : > { %p610_p3 = pnand %p613_p2, %p809_p8 }
 0x111   : > { %717 = dma.done.wait (!%p610_p3), %s481_s16, 256  }
 0x112   : > { %719 = vsyncadd (!%p610_p3), %s481_s16, 4294967040  ;;  %s15_s14 = sadd.s32 1, %s742_s14   ;;  %s903_s9 = smov %s726_s10 }
 0x113   : > { %p12_p5 = scmp.ge.s32.totalorder %s15_s14, 4   ;;  %s904_s10 = smov %s730_s11 }
 0x114   : > { %s905_s11 = smov %s815_s22  ;;  %s906_s12 = smov %s738_s13 }
 0x115   : > { %s907_s13 = smov %s909_s17  ;;  %14 = sbr.rel (!%p12_p5) target bundleno = 4 (0x4), region = 68 }
 0x11c   :  { %486 = vsyncpa [#allocation3], 1 }
 0x11d   :  { %488 = vsyncpa [#allocation3 + $0x1], 1 }

</bundles_post_ra>
